<compile_context>
chip_gen: v7x
topology: tpu7x:2x2x1
jax: 0.10.0
libtpu: 0.0.40
codegen_flags: <defaults>
</compile_context>

<pallas_src>
import functools

import jax
import jax.numpy as jnp
from jax.experimental import pallas as pl
from jax.experimental.pallas import tpu as pltpu


def _pixel_shuffle_down_kernel(x_ref, sel_ref, o_ref, *, scale, out_h, out_w):
    """One (batch, channel-block) tile.

    x_ref:   (C_BLK, h_c, w_c)            input spatial tiles
    sel_ref: (scale, w_c, out_w)           precomputed 0/1 lane-deinterleave selectors
    o_ref:   (C_BLK, scale*scale*out_h, out_w)
             per input channel c, rows [(i*scale+j)*out_h : ...] hold output channel
             c*scale^2 + i*scale + j  (so a wrapper reshape gives the torch layout).
    """
    c_blk = x_ref.shape[0]
    w_c = x_ref.shape[2]

    # Hoist the (tiny) selector loads out of the unrolled loops.
    sels = [sel_ref[j] for j in range(scale)]  # each (w_c, out_w), 0/1 in x dtype

    for i in range(scale):
        # Sublane-strided row deinterleave (free-ish): rows[c, oh, :] = x[c, oh*s + i, :]
        rows = x_ref[:, pl.ds(i, out_h, stride=scale), :]        # (c_blk, out_h, w_c)
        rows2d = rows.reshape(c_blk * out_h, w_c)                # merge leading dims
        for j in range(scale):
            # Lane deinterleave via one exact 0/1 selection matmul on the MXU.
            res = jnp.dot(rows2d, sels[j], preferred_element_type=jnp.float32)
            res = res.reshape(c_blk, out_h, out_w).astype(o_ref.dtype)
            off = (i * scale + j) * out_h
            o_ref[:, off:off + out_h, :] = res


def pixel_shuffle_down(x, scale=2, vmem_data_budget_bytes=8 * 1024 * 1024):
    orig_dtype = x.dtype
    b, c, h, w = x.shape
    h_c = h - h % scale
    w_c = w - w % scale
    out_h = h_c // scale
    out_w = w_c // scale
    out_c = c * scale * scale

    if out_h == 0 or out_w == 0:
        return jnp.zeros((b, out_c, out_h, out_w), orig_dtype)

    if (h_c, w_c) != (h, w):
        # TODO(synk): fold the crop into the BlockSpec index_map when (h_c, w_c)
        # satisfy the (8,128) tiling constraint, to avoid this HBM copy.
        x = x[:, :, :h_c, :w_c]

    if x.dtype != jnp.float32 and x.dtype != jnp.bfloat16:
        # TODO(synk): float path is exact for ints only when |x| < 2^24.
        x = x.astype(jnp.float32)

    # --- channel-block sizing against a conservative VMEM budget -------------
    # in-tile + out-tile have identical byte counts; x2 for double buffering.
    itemsize = x.dtype.itemsize
    per_chan_bytes = 4 * h_c * w_c * itemsize
    c_blk = int(min(c, max(1, vmem_data_budget_bytes // per_chan_bytes)))
    while c % c_blk:
        c_blk -= 1

    # --- precomputed 0/1 lane-deinterleave selectors (resident in VMEM) ------
    # sel[j, wcol, ow] = 1  iff  wcol == ow*scale + j
    sel = (
        jnp.arange(w_c, dtype=jnp.int32)[None, :, None]
        == scale * jnp.arange(out_w, dtype=jnp.int32)[None, None, :]
        + jnp.arange(scale, dtype=jnp.int32)[:, None, None]
    ).astype(x.dtype)                                            # (scale, w_c, out_w)

    kernel = functools.partial(
        _pixel_shuffle_down_kernel, scale=scale, out_h=out_h, out_w=out_w
    )

    out = pl.pallas_call(
        kernel,
        # (B, C, s*s*out_h, out_w): a free contiguous reshape away from torch layout.
        out_shape=jax.ShapeDtypeStruct((b, c, scale * scale * out_h, out_w), x.dtype),
        grid=(b, c // c_blk),
        in_specs=[
            # C_BLK channels' full spatial tiles per grid step (batch dim squeezed).
            pl.BlockSpec((None, c_blk, h_c, w_c), lambda bi, ci: (bi, ci, 0, 0)),
            # Selectors: same block for every grid step -> stay resident in VMEM.
            pl.BlockSpec((scale, w_c, out_w), lambda bi, ci: (0, 0, 0)),
        ],
        out_specs=pl.BlockSpec(
            (None, c_blk, scale * scale * out_h, out_w),
            lambda bi, ci: (bi, ci, 0, 0),
        ),
        compiler_params=pltpu.CompilerParams(
            dimension_semantics=("parallel", "parallel"),
            vmem_limit_bytes=32 * 1024 * 1024,
        ),
    )(x, sel)

    out = out.reshape(b, out_c, out_h, out_w)   # free: contiguous split+merge
    return out.astype(orig_dtype)


def _reference_pixel_shuffle_down(x, scale=2):
    b, c, h, w = x.shape
    h_c, w_c = h - h % scale, w - w % scale
    x = x[:, :, :h_c, :w_c]
    oh, ow = h_c // scale, w_c // scale
    x = x.reshape(b, c, oh, scale, ow, scale)
    x = jnp.transpose(x, (0, 1, 3, 5, 2, 4))
    return x.reshape(b, c * scale * scale, oh, ow)


if __name__ == "__main__":
    key = jax.random.PRNGKey(0)
    x = jax.random.normal(key, (2, 4, 16, 16), dtype=jnp.float32)

    out = jax.block_until_ready(pixel_shuffle_down(x, scale=2))
    ref = _reference_pixel_shuffle_down(x, scale=2)
    assert out.shape == (2, 16, 8, 8), out.shape
    assert out.dtype == x.dtype, out.dtype
    assert jnp.array_equal(out, ref), "f32 mismatch vs reference"

    # bf16 stays bf16 end-to-end through the kernel (exact selection matmuls).
    xb = x.astype(jnp.bfloat16)
    outb = jax.block_until_ready(pixel_shuffle_down(xb, scale=2))
    assert outb.dtype == jnp.bfloat16
    assert jnp.array_equal(outb, _reference_pixel_shuffle_down(xb, scale=2)), "bf16 mismatch"

    # Odd spatial dims exercise the crop glue (same as torch's slicing).
    x2 = jax.random.normal(jax.random.PRNGKey(1), (1, 3, 17, 18), dtype=jnp.float32)
    out2 = jax.block_until_ready(pixel_shuffle_down(x2, scale=2))
    assert jnp.array_equal(out2, _reference_pixel_shuffle_down(x2, scale=2)), "crop mismatch"

    print("KERNEL_OK")
</pallas_src>

<mosaic_0001>
module attributes {stable_mosaic.version = 11 : i64} {
  func.func @_pixel_shuffle_down_kernel(%arg0: i32, %arg1: i32, %arg2: memref<1x4x16x16xf32, #tpu.memory_space<vmem>>, %arg3: memref<2x16x8xf32, #tpu.memory_space<vmem>>, %arg4: memref<1x4x32x8xf32, #tpu.memory_space<vmem>>) attributes {dimension_semantics = [#tpu.dimension_semantics<parallel>, #tpu.dimension_semantics<parallel>], iteration_bounds = array<i64: 2, 1>, scalar_prefetch = 0 : i64, scratch_operands = 0 : i64, tpu.core_type = #tpu.core_type<tc>, window_params = [{transform_indices = @transform_0, window_bounds = array<i64: 1, 4, 16, 16>}, {pipeline_mode = #tpu.pipeline_mode<synchronous>, transform_indices = @transform_1, window_bounds = array<i64: 2, 16, 8>}, {transform_indices = @transform_2, window_bounds = array<i64: 1, 4, 32, 8>}]} {
    %c0 = arith.constant 0 : index
    %c0_0 = arith.constant 0 : index
    %c0_1 = arith.constant 0 : index
    %0 = vector.load %arg3[%c0, %c0_0, %c0_1] : memref<2x16x8xf32, #tpu.memory_space<vmem>>, vector<1x16x8xf32>
    %1 = vector.shape_cast %0 : vector<1x16x8xf32> to vector<16x8xf32>
    %c1 = arith.constant 1 : index
    %c0_2 = arith.constant 0 : index
    %c0_3 = arith.constant 0 : index
    %2 = vector.load %arg3[%c1, %c0_2, %c0_3] : memref<2x16x8xf32, #tpu.memory_space<vmem>>, vector<1x16x8xf32>
    %3 = vector.shape_cast %2 : vector<1x16x8xf32> to vector<16x8xf32>
    %c0_4 = arith.constant 0 : index
    %c0_5 = arith.constant 0 : index
    %c0_6 = arith.constant 0 : index
    %c0_7 = arith.constant 0 : index
    %4 = tpu.strided_load %arg2[%c0_4, %c0_5, %c0_6, %c0_7] {strides = array<i32: 1, 1, 2, 1>} : memref<1x4x16x16xf32, #tpu.memory_space<vmem>>, vector<1x4x8x16xf32>
    %5 = vector.shape_cast %4 : vector<1x4x8x16xf32> to vector<4x8x16xf32>
    %6 = vector.shape_cast %5 : vector<4x8x16xf32> to vector<32x16xf32>
    %cst = arith.constant dense<0.000000e+00> : vector<32x8xf32>
    %7 = tpu.matmul %6, %1, %cst {dimension_numbers = #tpu.dot_dimension_numbers<[1], [0], [0], [1], [0, 0, 1, 1], [], []>} : vector<32x16xf32>, vector<16x8xf32>, vector<32x8xf32> -> vector<32x8xf32>
    %8 = vector.shape_cast %7 : vector<32x8xf32> to vector<4x8x8xf32>
    %c0_8 = arith.constant 0 : index
    %c0_9 = arith.constant 0 : index
    %c0_10 = arith.constant 0 : index
    %c0_11 = arith.constant 0 : index
    %9 = vector.load %arg4[%c0_8, %c0_9, %c0_10, %c0_11] : memref<1x4x32x8xf32, #tpu.memory_space<vmem>>, vector<1x4x8x8xf32>
    %10 = vector.shape_cast %9 : vector<1x4x8x8xf32> to vector<4x8x8xf32>
    %11 = vector.shape_cast %8 : vector<4x8x8xf32> to vector<1x4x8x8xf32>
    tpu.vector_store %arg4[%c0_8, %c0_9, %c0_10, %c0_11], %11 {strides = array<i32>} : memref<1x4x32x8xf32, #tpu.memory_space<vmem>>, vector<1x4x8x8xf32>,
    %cst_12 = arith.constant dense<0.000000e+00> : vector<32x8xf32>
    %12 = tpu.matmul %6, %3, %cst_12 {dimension_numbers = #tpu.dot_dimension_numbers<[1], [0], [0], [1], [0, 0, 1, 1], [], []>} : vector<32x16xf32>, vector<16x8xf32>, vector<32x8xf32> -> vector<32x8xf32>
    %13 = vector.shape_cast %12 : vector<32x8xf32> to vector<4x8x8xf32>
    %c0_13 = arith.constant 0 : index
    %c0_14 = arith.constant 0 : index
    %c8 = arith.constant 8 : index
    %c0_15 = arith.constant 0 : index
    %14 = vector.load %arg4[%c0_13, %c0_14, %c8, %c0_15] : memref<1x4x32x8xf32, #tpu.memory_space<vmem>>, vector<1x4x8x8xf32>
    %15 = vector.shape_cast %14 : vector<1x4x8x8xf32> to vector<4x8x8xf32>
    %16 = vector.shape_cast %13 : vector<4x8x8xf32> to vector<1x4x8x8xf32>
    tpu.vector_store %arg4[%c0_13, %c0_14, %c8, %c0_15], %16 {strides = array<i32>} : memref<1x4x32x8xf32, #tpu.memory_space<vmem>>, vector<1x4x8x8xf32>,
    %c0_16 = arith.constant 0 : index
    %c0_17 = arith.constant 0 : index
    %c1_18 = arith.constant 1 : index
    %c0_19 = arith.constant 0 : index
    %17 = tpu.strided_load %arg2[%c0_16, %c0_17, %c1_18, %c0_19] {strides = array<i32: 1, 1, 2, 1>} : memref<1x4x16x16xf32, #tpu.memory_space<vmem>>, vector<1x4x8x16xf32>
    %18 = vector.shape_cast %17 : vector<1x4x8x16xf32> to vector<4x8x16xf32>
    %19 = vector.shape_cast %18 : vector<4x8x16xf32> to vector<32x16xf32>
    %cst_20 = arith.constant dense<0.000000e+00> : vector<32x8xf32>
    %20 = tpu.matmul %19, %1, %cst_20 {dimension_numbers = #tpu.dot_dimension_numbers<[1], [0], [0], [1], [0, 0, 1, 1], [], []>} : vector<32x16xf32>, vector<16x8xf32>, vector<32x8xf32> -> vector<32x8xf32>
    %21 = vector.shape_cast %20 : vector<32x8xf32> to vector<4x8x8xf32>
    %c0_21 = arith.constant 0 : index
    %c0_22 = arith.constant 0 : index
    %c16 = arith.constant 16 : index
    %c0_23 = arith.constant 0 : index
    %22 = vector.load %arg4[%c0_21, %c0_22, %c16, %c0_23] : memref<1x4x32x8xf32, #tpu.memory_space<vmem>>, vector<1x4x8x8xf32>
    %23 = vector.shape_cast %22 : vector<1x4x8x8xf32> to vector<4x8x8xf32>
    %24 = vector.shape_cast %21 : vector<4x8x8xf32> to vector<1x4x8x8xf32>
    tpu.vector_store %arg4[%c0_21, %c0_22, %c16, %c0_23], %24 {strides = array<i32>} : memref<1x4x32x8xf32, #tpu.memory_space<vmem>>, vector<1x4x8x8xf32>,
    %cst_24 = arith.constant dense<0.000000e+00> : vector<32x8xf32>
    %25 = tpu.matmul %19, %3, %cst_24 {dimension_numbers = #tpu.dot_dimension_numbers<[1], [0], [0], [1], [0, 0, 1, 1], [], []>} : vector<32x16xf32>, vector<16x8xf32>, vector<32x8xf32> -> vector<32x8xf32>
    %26 = vector.shape_cast %25 : vector<32x8xf32> to vector<4x8x8xf32>
    %c0_25 = arith.constant 0 : index
    %c0_26 = arith.constant 0 : index
    %c24 = arith.constant 24 : index
    %c0_27 = arith.constant 0 : index
    %27 = vector.load %arg4[%c0_25, %c0_26, %c24, %c0_27] : memref<1x4x32x8xf32, #tpu.memory_space<vmem>>, vector<1x4x8x8xf32>
    %28 = vector.shape_cast %27 : vector<1x4x8x8xf32> to vector<4x8x8xf32>
    %29 = vector.shape_cast %26 : vector<4x8x8xf32> to vector<1x4x8x8xf32>
    tpu.vector_store %arg4[%c0_25, %c0_26, %c24, %c0_27], %29 {strides = array<i32>} : memref<1x4x32x8xf32, #tpu.memory_space<vmem>>, vector<1x4x8x8xf32>,
    return
  }
  func.func @transform_0(%arg0: i32, %arg1: i32) -> (i32, i32, i32, i32) {
    %c0_i32 = arith.constant 0 : i32
    %c0_i32_0 = arith.constant 0 : i32
    %c0_i32_1 = arith.constant 0 : i32
    return %arg0, %arg1, %c0_i32, %c0_i32_0 : i32, i32, i32, i32
  }
  func.func @transform_1(%arg0: i32, %arg1: i32) -> (i32, i32, i32) {
    %c0_i32 = arith.constant 0 : i32
    %c0_i32_0 = arith.constant 0 : i32
    %c0_i32_1 = arith.constant 0 : i32
    %c0_i32_2 = arith.constant 0 : i32
    return %c0_i32, %c0_i32_0, %c0_i32_1 : i32, i32, i32
  }
  func.func @transform_2(%arg0: i32, %arg1: i32) -> (i32, i32, i32, i32) {
    %c0_i32 = arith.constant 0 : i32
    %c0_i32_0 = arith.constant 0 : i32
    %c0_i32_1 = arith.constant 0 : i32
    return %arg0, %arg1, %c0_i32, %c0_i32_0 : i32, i32, i32, i32
  }
}

</mosaic_0001>

<bundles_post_ra>
// kernel: tpu_custom_call.1
= control target key start
LH: loop header
LB: loop body
LE: loop exit
PB: predicated region body
PF: predicated region fallthrough
CT: control target
= control target key end

     0   :  { %7 = vsyncpa [#allocation3], 0  ;;  %s1171_s0 = inlined_call_operand.hbm [shape: f32[2,4,16,16], index: 0, kind: input, shape index: {}]   ;;  %s1172_s1 = inlined_call_operand.vmem [shape: f32[2,16,8], index: 1, kind: input, shape index: {}]   ;;  %s1173_s2 = inlined_call_operand.vmem [shape: f32[2,4,32,8], index: 2, kind: output, shape index: {}]  }
   0x1   :  { %9 = vsyncpa [#allocation3 + $0x1], 0  ;;  %s975_s9 = smov 0   ;;  %s977_s10 = smov 0  }
   0x2   :  { %s979_s11 = smov 0   ;;  %s981_s12 = smov 0  }
   0x3   :  { %s983_s13 = smov 0   ;;  %s985_s14 = smov 0  }
   0x4 LB: > { %s698_s15 = sadd.s32 4294967295, %s955_s14   ;;  %s27_s16 = sadd.s32 1, %s951_s13  ;;  %s955_s14 = sphi %s985_s14, %s15_s14   ;;  %s951_s13 = sphi %s983_s13, %s1181_s13   ;;  %s947_s12 = sphi %s981_s12, %s1180_s12   ;;  %s943_s11 = sphi %s979_s11, %s1179_s11   ;;  %s939_s10 = sphi %s977_s10, %s1178_s10   ;;  %s935_s9 = sphi %s975_s9, %s1177_s9  }
   0x5   : > { %p29_p0 = scmp.ge.s32.totalorder %s27_s16, 2  ;;  %s36_s17 = sadd.s32 1, %s943_s11 }
   0x6   : > { %p43_p1 = scmp.ne.s32.totalorder %s943_s11, %s939_s10  ;;  %p44_p2 = scmp.eq.s32.totalorder %s955_s14, 0 }
   0x7   : > { %s1183_s16 = smov (%p29_p0, %s27_s16), 0  ;;  %p49_p4 = scmp.ne.s32.totalorder %s939_s10, %s935_s9 }
   0x8   : > { %p1011_p3 = por %p44_p2, %p43_p1  ;;  %s31_s19 = ssub.s32 %s951_s13, %s1183_s16 }
   0x9   : > { %p50_p5 = scmp.eq.s32.totalorder %s698_s15, 0  ;;  %p34_p6 = scmp.eq.s32.totalorder %s31_s19, 0 }
   0xa   : > { %p824_p8 = scmp.lt.s32.totalorder %s955_s14, 2  ;;  %s125_s22 = sand.u32 1, %s943_s11  }
   0xb   : > { %p1018_p7 = por %p50_p5, %p49_p4  ;;  %s736_s23 = sshll.u32 %s951_s13, 10 }
   0xc   : > { %s1024_s21 = scalar_select %p34_p6, %s943_s11, %s36_s17  }
   0xd   : > { %s702_s24 = sshll.u32 %s125_s22, 6  ;;  %s1031_s27 = scalar_lea.hbm %s1171_s0, %s736_s23 }
   0xe   : > { %s129_s28 = scalar_lea.vmem [#allocation2], %s702_s24  ;;  %p1035_p9 = pnand %p824_p8, %p1011_p3 }
   0xf   : > { %s139_s29 = sshll.u32 %s129_s28, 4  ;;  %s1041_s3 = scalar_lea.sflag [#allocation3], %s125_s22  ;;  %s1039_s29 = int_to_ptr.vmem [resolvable:$true] %s139_s29 }
  0x10   : > { %s875_s4 = scalar_lea.hbm %s1031_s27, 1024  ;;  %p877_p11 = pneg %p1035_p9 }
  0x11   : > { %p876_p10 = scmp.ne.s32.totalorder %s1031_s27, %s875_s4  ;;  %s880_s7 = scalar_lea.hbm %s1171_s0, 2048 }
  0x12   : > { %p881_p0 = scmp.lt.u32.totalorder %s1031_s27, %s1171_s0  ;;  %p882_p1 = scmp.lt.u32.totalorder %s880_s7, %s875_s4 }
  0x13   : > { %p878_p12 = pnand %p877_p11, %p876_p10  ;;  %p884_p3 = scmp.lt.u32.totalorder %s875_s4, %s1031_s27 }
  0x14   : > { %p883_p2 = por %p882_p1, %p881_p0 }
  0x15   : > { %p879_p13 = pneg %p878_p12 }
  0x16   : > { %p885_p4 = por %p884_p3, %p883_p2 }
  0x18   : > { %p886_p5 = pnand %p885_p4, %p879_p13 }
  0x1a   : > { %889 = shalt.err (!%p886_p5)
}
  0x1b   : > { %s890_s15 = scalar_lea.vmem %s1039_s29, 1024  ;;  %s957_s17 = smov [#allocation2]  }
  0x1c   : > { %p891_p6 = scmp.ne.s32.totalorder %s1039_s29, %s890_s15  ;;  %s895_s18 = sshll.u32 %s957_s17, 4  ;;  %s896_s18 = int_to_ptr.vmem [resolvable:$false] %s895_s18 }
  0x1d   : > { %s897_s19 = scalar_lea.vmem %s896_s18, 2048  ;;  %p898_p12 = scmp.lt.s32.totalorder %s1039_s29, %s896_s18 }
  0x1e   : > { %p893_p8 = pnand %p891_p6, %p877_p11  ;;  %p899_p0 = scmp.lt.s32.totalorder %s897_s19, %s890_s15 }
  0x20   : > { %p894_p10 = pneg %p893_p8  ;;  %p900_p1 = por %p899_p0, %p898_p12 }
  0x22   : > { %p901_p2 = pnand %p900_p1, %p894_p10 }
  0x24   : > { %904 = shalt.err (!%p901_p2)
}
  0x25   : > { %s958_s22 = smov 128   ;;  %s959_s23 = smov 8  }
  0x26   : > { %823 = dma.hbm_to_vmem [thread:$0]  (!%p1035_p9), %s1031_s27, 1024, %s1039_s29, %s1041_s3, %s958_s22, %s958_s22, %s959_s23  }
  0x27   : > { %p705_p11 = scmp.ge.s32.totalorder %s955_s14, 1  ;;  %p147_p13 = scmp.lt.s32.totalorder %s955_s14, 3 }
  0x29   : > { %p148_p3 = pnand %p705_p11, %p147_p13 }
  0x2a   : > { %s153_s24 = sand.u32 (!%p148_p3), 1, %s939_s10  }
  0x2b   : > { %151 = sbr.rel (%p148_p3) target bundleno = 285 (0x11d), region = 28  ;;  %s706_s25 = sshll.u32 (!%p148_p3), %s153_s24, 6 }
  0x2c   : > { %s154_s26 = scalar_lea.sflag (!%p148_p3), [#allocation3], %s153_s24  ;;  %s1072_s28 = scalar_lea.vmem (!%p148_p3), [#allocation2], %s706_s25 }
  0x32   : > { %930 = dma.done.wait (%p1018_p7), %s154_s26, 1024  }
  0x33   : > { %932 = vsyncadd (%p1018_p7), %s154_s26, 4294966272  ;;  %vm207_vm0 = vcmask 130048   ;;  %v195_v0 = vld [vmem:[%s1172_s1] sm:$0xff]  ;;  %v196_v1 = vld [vmem:[%s1172_s1 + $0x8] sm:$0xff]  ;;  %p185_p7 = scmp.lt.s32.totalorder %s947_s12, 1  ;;  %vm305_vm1 = vcmask 64512  }
  0x34   : > { %v709_v2 = vld [vmem:[%s1172_s1 + $0x10] sm:$0xff]  ;;  %v802_v3 = vpack.c.bf16 %v196_v1, %v195_v0  ;;  %v710_v4 = vld [vmem:[%s1172_s1 + $0x18] sm:$0xff]  ;;  %v200_v5 = vld [vmem:[%s1072_s28] ss:$2 sm:$0xff] }
  0x35   : > { %v806_v6 = vpack.c.bf16 %v710_v4, %v709_v2  ;;  %766 = vmatprep.mubr.msk.f32.mxu0 %vm207_vm0, %v200_v5  ;;  %776 = vmatprep.mubr.msk.f32.mxu1 %vm207_vm0, %v200_v5  ;;  %v711_v7 = vld [vmem:[%s1072_s28 + $0x10] ss:$2 sm:$0xff]  ;;  %v712_v8 = vld [vmem:[%s1072_s28 + $0x20] ss:$2 sm:$0xff]  ;;  %v722_v10 = vld [vmem:[%s1072_s28 + $0x1] ss:$2 sm:$0xff] }
  0x36   : > { %803 = vmatprep.subr.bf16.mxu0 %v802_v3  ;;  %v713_v9 = vld [vmem:[%s1072_s28 + $0x30] ss:$2 sm:$0xff]  ;;  %v723_v11 = vld [vmem:[%s1072_s28 + $0x11] ss:$2 sm:$0xff]  ;;  %v724_v12 = vld [vmem:[%s1072_s28 + $0x21] ss:$2 sm:$0xff] }
  0x37   : > { %807 = vmatprep.subr.bf16.mxu1 %v806_v6  ;;  %805 = vmatpush3.bf16.msra.mxu0 %v802_v3  ;;  %v725_v13 = vld [vmem:[%s1072_s28 + $0x31] ss:$2 sm:$0xff]  ;;  %s1185_s12 = smov (!%p185_p7, %s947_s12), 1 }
  0x38   : > { %809 = vmatpush3.bf16.msra.mxu1 %v806_v6  ;;  %811 = vmatprep.subr.bf16.mxu0 %v802_v3  ;;  %s737_s7 = sshll.u32 %s1185_s12, 7 }
  0x39   : > { %815 = vmatprep.subr.bf16.mxu1 %v806_v6  ;;  %s1119_s15 = scalar_lea.vmem %s1173_s2, %s737_s7 }
  0x3a   : > { %767 = vmatmul.mubr.msk.f32.vlgmr.msra.gmra.mrb[0].mxu0 %vm207_vm0, %v711_v7 }
  0x3b   : > { %777 = vmatmul.mubr.msk.f32.vlgmr.msra.gmra.mrb[0].mxu1 %vm207_vm0, %v711_v7  ;;  %813 = vmatpush3.bf16.msra.mxu0 %v802_v3 }
  0x3c   : > { %817 = vmatpush3.bf16.msra.mxu1 %v806_v6  ;;  %769 = vmatprep.mubr.msk.f32.mxu0 %vm207_vm0, %v712_v8 }
  0x3d   : > { %779 = vmatprep.mubr.msk.f32.mxu1 %vm207_vm0, %v712_v8 }
  0x3e   : > { %770 = vmatmul.mubr.msk.f32.gmra.mrb[2].mxu0 %vm207_vm0, %v713_v9 }
  0x3f   : > { %780 = vmatmul.mubr.msk.f32.gmra.mrb[2].mxu1 %vm207_vm0, %v713_v9  ;;  %786 = vmatprep.mubr.msk.f32.mxu0 %vm207_vm0, %v722_v10 }
  0x40   : > { %796 = vmatprep.mubr.msk.f32.mxu1 %vm207_vm0, %v722_v10 }
  0x42   : > { %787 = vmatmul.mubr.msk.f32.vlgmr.msra.gmra.mrb[4].mxu0 %vm207_vm0, %v723_v11 }
  0x43   : > { %797 = vmatmul.mubr.msk.f32.vlgmr.msra.gmra.mrb[4].mxu1 %vm207_vm0, %v723_v11  ;;  %789 = vmatprep.mubr.msk.f32.mxu0 %vm207_vm0, %v724_v12 }
  0x44   : > { %799 = vmatprep.mubr.msk.f32.mxu1 %vm207_vm0, %v724_v12 }
  0x46   : > { %790 = vmatmul.mubr.msk.f32.gmra.mrb[6].mxu0 %vm207_vm0, %v725_v13 }
  0x47   : > { %800 = vmatmul.mubr.msk.f32.gmra.mrb[6].mxu1 %vm207_vm0, %v725_v13 }
 0x10d   : > { %v768_v14 = vpop.f32.mrb[0].mxu0 }
 0x10e   : > { %307 = vst.msk [vmem:[%s1119_s15 + $0x20] sm:$0xff] %vm305_vm1, %v768_v14  ;;  %v778_v15 = vpop.f32.mrb[0].mxu1  ;;  %v286_v16 = vpop.f32.mrb[1].mxu0 }
 0x10f   : > { %396 = vst.msk [vmem:[%s1119_s15 + $0x28] sm:$0xff] %vm305_vm1, %v778_v15  ;;  %306 = vst.msk [vmem:[%s1119_s15] sm:$0xff] %vm305_vm1, %v286_v16  ;;  %v376_v17 = vpop.f32.mrb[1].mxu1 }
 0x110   : > { %395 = vst.msk [vmem:[%s1119_s15 + $0x8] sm:$0xff] %vm305_vm1, %v376_v17 }
 0x111   : > { %v771_v18 = vpop.f32.mrb[2].mxu0 }
 0x112   : > { %309 = vst.msk [vmem:[%s1119_s15 + $0x60] sm:$0xff] %vm305_vm1, %v771_v18  ;;  %v781_v19 = vpop.f32.mrb[2].mxu1  ;;  %v296_v20 = vpop.f32.mrb[3].mxu0 }
 0x113   : > { %398 = vst.msk [vmem:[%s1119_s15 + $0x68] sm:$0xff] %vm305_vm1, %v781_v19  ;;  %308 = vst.msk [vmem:[%s1119_s15 + $0x40] sm:$0xff] %vm305_vm1, %v296_v20  ;;  %v386_v21 = vpop.f32.mrb[3].mxu1 }
 0x114   : > { %397 = vst.msk [vmem:[%s1119_s15 + $0x48] sm:$0xff] %vm305_vm1, %v386_v21 }
 0x115   : > { %v788_v22 = vpop.f32.mrb[4].mxu0 }
 0x116   : > { %505 = vst.msk [vmem:[%s1119_s15 + $0x30] sm:$0xff] %vm305_vm1, %v788_v22  ;;  %v798_v23 = vpop.f32.mrb[4].mxu1  ;;  %v485_v24 = vpop.f32.mrb[5].mxu0 }
 0x117   : > { %594 = vst.msk [vmem:[%s1119_s15 + $0x38] sm:$0xff] %vm305_vm1, %v798_v23  ;;  %504 = vst.msk [vmem:[%s1119_s15 + $0x10] sm:$0xff] %vm305_vm1, %v485_v24  ;;  %v574_v25 = vpop.f32.mrb[5].mxu1 }
 0x118   : > { %593 = vst.msk [vmem:[%s1119_s15 + $0x18] sm:$0xff] %vm305_vm1, %v574_v25 }
 0x119   : > { %v791_v26 = vpop.f32.mrb[6].mxu0 }
 0x11a   : > { %507 = vst.msk [vmem:[%s1119_s15 + $0x70] sm:$0xff] %vm305_vm1, %v791_v26  ;;  %v801_v27 = vpop.f32.mrb[6].mxu1  ;;  %v495_v28 = vpop.f32.mrb[7].mxu0 }
 0x11b   : > { %596 = vst.msk [vmem:[%s1119_s15 + $0x78] sm:$0xff] %vm305_vm1, %v801_v27  ;;  %506 = vst.msk [vmem:[%s1119_s15 + $0x50] sm:$0xff] %vm305_vm1, %v495_v28  ;;  %v584_v29 = vpop.f32.mrb[7].mxu1 }
 0x11c   : > { %595 = vst.msk [vmem:[%s1119_s15 + $0x58] sm:$0xff] %vm305_vm1, %v584_v29 }
 0x11d PF: > { %s15_s14 = sadd.s32 1, %s955_s14   ;;  %s1177_s9 = smov %s939_s10 }
 0x11e   : > { %p12_p9 = scmp.ge.s32.totalorder %s15_s14, 4   ;;  %s1178_s10 = smov %s943_s11 }
 0x11f   : > { %s1179_s11 = smov %s1024_s21  ;;  %s1180_s12 = smov %s951_s13 }
 0x120   : > { %s1181_s13 = smov %s1183_s16  ;;  %14 = sbr.rel (!%p12_p9) target bundleno = 4 (0x4), region = 76 }
 0x127   :  { %629 = vsyncpa [#allocation3], 1 }
 0x128   :  { %631 = vsyncpa [#allocation3 + $0x1], 1 }

</bundles_post_ra>
